<compile_context>
chip_gen: v6e
topology: v6e:2x2x1
jax: 0.10.0
libtpu: 0.0.40
codegen_flags: <defaults>
</compile_context>

<pallas_src>
import functools

import jax
import jax.numpy as jnp
from jax import lax
from jax.experimental import pallas as pl
from jax.experimental.pallas import tpu as pltpu

# Deterministic parameters (the module's __init__ only defines `weight`;
# child-loss weights / gamma are synthetic but fixed).
COMPOSITE_WEIGHT = 1.0   # CompositeLoss.weight
TD_WEIGHT = 0.5          # weight of the TD child loss
VAL_WEIGHT = 2.0         # weight of the value child loss
GAMMA = 0.99             # discount used inside the TD target

_LANE = 128
_DEFAULT_TILE_BYTES = 2 * 1024 * 1024   # per-input tile per step (x5 inputs x2 buffers)
_VMEM_LIMIT_BYTES = 32 * 1024 * 1024    # <= v7x 64 MiB physical; overrides v5e 16 MiB default
_SMALL_N_THRESHOLD = 1 << 20            # below this, launch overhead dominates -> pure JAX


def _round_down(x, m):
    return (x // m) * m


def _round_up(x, m):
    return -(-x // m) * m


def _row_align(dtype):
    # Native sublane packing: 8 rows (32-bit), 16 (bf16/f16), 32 (int8/fp8).
    return max(8, 32 // jnp.dtype(dtype).itemsize)


def _composite_partial_kernel(q_ref, v_ref, r_ref, q_hat_ref, v_next_ref, part_ref,
                              *, tail_rows):
    """One lane-dense tile: fused weighted squared errors + XLU-free partial fold."""
    q = q_ref[...].astype(jnp.float32)
    v = v_ref[...].astype(jnp.float32)
    r = r_ref[...].astype(jnp.float32)
    q_hat = q_hat_ref[...].astype(jnp.float32)
    v_next = v_next_ref[...].astype(jnp.float32)

    # TD loss term: q(x_t, a_t) vs bootstrapped target r_t + gamma * v(x_{t+1})
    td_err = q - (r + GAMMA * v_next)
    # Value loss term: v(x_t) vs q_hat(x_t, a_t)
    val_err = v - q_hat
    w = TD_WEIGHT * (td_err * td_err) + VAL_WEIGHT * (val_err * val_err)

    br, cols = w.shape  # static block shape

    if tail_rows:
        # Last grid step may cover rows past the true extent (garbage in the block
        # buffer).  Mask them with a cheap iota compare instead of padding in HBM.
        is_last = pl.program_id(0) == pl.num_programs(0) - 1
        limit = jnp.where(is_last, jnp.int32(tail_rows), jnp.int32(br))
        rid = lax.broadcasted_iota(jnp.int32, w.shape, 0)
        w = jnp.where(rid < limit, w, 0.0)

    if br % 8 == 0:
        # Fold sublane groups of 8: pure elementwise vreg adds (no XLU work).
        part_ref[...] = jnp.sum(w.reshape(br // 8, 8, cols), axis=0)
    else:
        # Tiny full-dim blocks only (rows < 8 or odd full-dim row counts).
        s = jnp.sum(w, axis=0, keepdims=True)                      # (1, cols)
        rid8 = lax.broadcasted_iota(jnp.int32, (8, cols), 0)
        part_ref[...] = jnp.where(rid8 == 0, jnp.broadcast_to(s, (8, cols)), 0.0)


def _plan(shape, dtype, target_tile_bytes):
    """Pick a 2-D (rows, cols) presentation with cols a multiple of 128, copy-free
    whenever the natural layout already is lane-aligned."""
    n = 1
    for s in shape:
        n *= int(s)
    itemsize = jnp.dtype(dtype).itemsize
    align = _row_align(dtype)

    if len(shape) >= 2 and shape[-1] % _LANE == 0 \
            and shape[-1] * itemsize * align <= target_tile_bytes:
        mode, cols = "natural", int(shape[-1])          # zero-copy for 2-D inputs
        rows = n // cols
    elif n % _LANE == 0:
        mode, cols = "flatten", _LANE                   # reshape only, no pad
        for c in (1024, 512, 256):
            if n % c == 0 and c * itemsize * align <= target_tile_bytes:
                cols = c
                break
        rows = n // cols
    else:
        mode, cols = "pad", _LANE                       # uncommon: zero-pad to a lane
        rows = _round_up(n, cols) // cols               # boundary (exact: zero-at-zero)
    return mode, rows, cols, n, itemsize, align


def _prep(x, mode, rows, cols):
    if mode == "natural":
        return x if x.ndim == 2 else x.reshape(rows, cols)
    if mode == "flatten":
        return x.reshape(rows, cols)
    flat = x.reshape(-1)
    return jnp.pad(flat, (0, rows * cols - flat.shape[0])).reshape(rows, cols)


def _choose_block_rows(rows, cols, itemsize, align, target_tile_bytes, user_br):
    if user_br is not None:
        br = max(align, _round_down(int(user_br), align))
    else:
        br = max(align, _round_down(target_tile_bytes // (cols * itemsize), align))
    # Guarantee >= 2 grid steps whenever possible so both v7x TensorCores get work.
    cap = _round_down(rows - 1, align)
    if cap >= align:
        br = min(br, cap)
    if br > rows:
        br = rows          # tiny inputs: single full-dim block (always a legal block)
    return br


def composite_loss(input_ids, q, v, r, q_hat, v_next, *,
                   block_rows=None,
                   target_tile_bytes=_DEFAULT_TILE_BYTES,
                   min_pallas_elems=_SMALL_N_THRESHOLD):
    """Wrapper matching CompositeLoss.forward(input_ids, q, v, r, q_hat, v_next)."""
    del input_ids  # not consumed by the two concrete child losses
    assert q.shape == v.shape == r.shape == q_hat.shape == v_next.shape

    n = q.size
    if n < min_pallas_elems:
        # Launch / partials round-trip overhead dominates for small N.
        return composite_loss_ref(None, q, v, r, q_hat, v_next)

    mode, rows, cols, n, itemsize, align = _plan(q.shape, q.dtype, target_tile_bytes)
    br = _choose_block_rows(rows, cols, itemsize, align, target_tile_bytes, block_rows)
    num_tiles = -(-rows // br)
    tail = rows % br  # static; nonzero only when the last grid step is ragged

    arrs = [_prep(x, mode, rows, cols) for x in (q, v, r, q_hat, v_next)]

    kernel = functools.partial(_composite_partial_kernel, tail_rows=tail)

    cost = pl.CostEstimate(
        flops=10 * n,
        transcendentals=0,
        bytes_accessed=5 * rows * cols * itemsize + num_tiles * 8 * cols * 4,
    )

    in_spec = pl.BlockSpec((br, cols), lambda i: (i, 0))
    out_spec = pl.BlockSpec((8, cols), lambda i: (i, 0))

    partials = pl.pallas_call(
        kernel,
        out_shape=jax.ShapeDtypeStruct((num_tiles * 8, cols), jnp.float32),
        grid_spec=pltpu.PrefetchScalarGridSpec(
            num_scalar_prefetch=0,
            grid=(num_tiles,),
            in_specs=[in_spec] * 5,
            out_specs=out_spec,
        ),
        compiler_params=pltpu.CompilerParams(
            dimension_semantics=("parallel",),       # megacore-friendly on v7x
            vmem_limit_bytes=_VMEM_LIMIT_BYTES,      # tiles sized well below this
        ),
        cost_estimate=cost,
    )(*arrs)

    # Tiny final reduction + static 1/N scale in XLA.
    return (COMPOSITE_WEIGHT / n) * jnp.sum(partials)


def composite_loss_ref(input_ids, q, v, r, q_hat, v_next):
    """Pure-JAX reference for correctness checking."""
    del input_ids
    q = q.astype(jnp.float32)
    v = v.astype(jnp.float32)
    r = r.astype(jnp.float32)
    q_hat = q_hat.astype(jnp.float32)
    v_next = v_next.astype(jnp.float32)
    td_loss = jnp.mean((q - (r + GAMMA * v_next)) ** 2)
    val_loss = jnp.mean((v - q_hat) ** 2)
    return COMPOSITE_WEIGHT * (TD_WEIGHT * td_loss + VAL_WEIGHT * val_loss)


if __name__ == "__main__":
    def make_inputs(key, shape, dtype=jnp.float32):
        ks = jax.random.split(key, 6)
        input_ids = jax.random.randint(ks[0], shape, 0, 1000, dtype=jnp.int32)
        tensors = [jax.random.normal(k, shape, dtype=dtype) for k in ks[1:]]
        return (input_ids, *tensors)

    def check(args, **kw):
        loss = composite_loss(*args, min_pallas_elems=0, **kw)  # force the Pallas path
        jax.block_until_ready(loss)
        ref = composite_loss_ref(*args)
        assert jnp.allclose(loss, ref, rtol=1e-5, atol=1e-5), (loss, ref)

    # Small token-level shape [batch=2, seq=8]: not lane-aligned -> pad fallback path.
    check(make_inputs(jax.random.PRNGKey(0), (2, 8)))

    # Lane-aligned [4, 4096]: natural zero-copy path, single full-dim block (rows < 8).
    check(make_inputs(jax.random.PRNGKey(1), (4, 4096)))

    # Lane-aligned [24, 512]: natural path, >=2 grid steps with a masked ragged tail.
    check(make_inputs(jax.random.PRNGKey(2), (24, 512)))

    # bf16 inputs [32, 256]: dtype-aware row alignment (16-row blocks), 2 grid steps.
    check(make_inputs(jax.random.PRNGKey(3), (32, 256), dtype=jnp.bfloat16))

    print("KERNEL_OK")
</pallas_src>

<mosaic_0001>
module attributes {stable_mosaic.version = 11 : i64} {
  func.func @_composite_partial_kernel(%arg0: i32, %arg1: memref<1x128xf32, #tpu.memory_space<vmem>>, %arg2: memref<1x128xf32, #tpu.memory_space<vmem>>, %arg3: memref<1x128xf32, #tpu.memory_space<vmem>>, %arg4: memref<1x128xf32, #tpu.memory_space<vmem>>, %arg5: memref<1x128xf32, #tpu.memory_space<vmem>>, %arg6: memref<8x128xf32, #tpu.memory_space<vmem>>) attributes {dimension_semantics = [#tpu.dimension_semantics<parallel>], iteration_bounds = array<i64: 1>, scalar_prefetch = 0 : i64, scratch_operands = 0 : i64, tpu.core_type = #tpu.core_type<tc>, window_params = [{transform_indices = @transform_0, window_bounds = array<i64: 1, 128>}, {transform_indices = @transform_1, window_bounds = array<i64: 1, 128>}, {transform_indices = @transform_2, window_bounds = array<i64: 1, 128>}, {transform_indices = @transform_3, window_bounds = array<i64: 1, 128>}, {transform_indices = @transform_4, window_bounds = array<i64: 1, 128>}, {transform_indices = @transform_5, window_bounds = array<i64: 8, 128>}]} {
    %c0 = arith.constant 0 : index
    %c0_0 = arith.constant 0 : index
    %0 = vector.load %arg1[%c0, %c0_0] : memref<1x128xf32, #tpu.memory_space<vmem>>, vector<1x128xf32>
    %c0_1 = arith.constant 0 : index
    %c0_2 = arith.constant 0 : index
    %1 = vector.load %arg2[%c0_1, %c0_2] : memref<1x128xf32, #tpu.memory_space<vmem>>, vector<1x128xf32>
    %c0_3 = arith.constant 0 : index
    %c0_4 = arith.constant 0 : index
    %2 = vector.load %arg3[%c0_3, %c0_4] : memref<1x128xf32, #tpu.memory_space<vmem>>, vector<1x128xf32>
    %c0_5 = arith.constant 0 : index
    %c0_6 = arith.constant 0 : index
    %3 = vector.load %arg4[%c0_5, %c0_6] : memref<1x128xf32, #tpu.memory_space<vmem>>, vector<1x128xf32>
    %c0_7 = arith.constant 0 : index
    %c0_8 = arith.constant 0 : index
    %4 = vector.load %arg5[%c0_7, %c0_8] : memref<1x128xf32, #tpu.memory_space<vmem>>, vector<1x128xf32>
    %cst = arith.constant 9.900000e-01 : f32
    %5 = vector.broadcast %cst : f32 to vector<1x128xf32>
    %6 = arith.mulf %5, %4 : vector<1x128xf32>
    %7 = arith.addf %2, %6 : vector<1x128xf32>
    %8 = arith.subf %0, %7 : vector<1x128xf32>
    %9 = arith.subf %1, %3 : vector<1x128xf32>
    %10 = arith.mulf %8, %8 : vector<1x128xf32>
    %cst_9 = arith.constant 5.000000e-01 : f32
    %11 = vector.broadcast %cst_9 : f32 to vector<1x128xf32>
    %12 = arith.mulf %11, %10 : vector<1x128xf32>
    %13 = arith.mulf %9, %9 : vector<1x128xf32>
    %cst_10 = arith.constant 2.000000e+00 : f32
    %14 = vector.broadcast %cst_10 : f32 to vector<1x128xf32>
    %15 = arith.mulf %14, %13 : vector<1x128xf32>
    %16 = arith.addf %12, %15 : vector<1x128xf32>
    %cst_11 = arith.constant dense<0.000000e+00> : vector<128xf32>
    %17 = vector.multi_reduction <add>, %16, %cst_11 [0] : vector<1x128xf32> to vector<128xf32>
    %18 = vector.shape_cast %17 : vector<128xf32> to vector<1x128xf32>
    %19 = tpu.iota {dimensions = array<i32: 0>} : vector<8x128xi32>
    %c0_i32 = arith.constant 0 : i32
    %20 = vector.broadcast %c0_i32 : i32 to vector<8x128xi32>
    %21 = arith.cmpi eq, %19, %20 : vector<8x128xi32>
    %22 = vector.shape_cast %18 : vector<1x128xf32> to vector<1x128xf32>
    %23 = vector.broadcast %22 : vector<1x128xf32> to vector<8x128xf32>
    %cst_12 = arith.constant 0.000000e+00 : f32
    %24 = vector.broadcast %cst_12 : f32 to vector<8x128xf32>
    %25 = arith.select %21, %23, %24 : vector<8x128xi1>, vector<8x128xf32>
    %c0_13 = arith.constant 0 : index
    %c0_14 = arith.constant 0 : index
    %26 = vector.load %arg6[%c0_13, %c0_14] : memref<8x128xf32, #tpu.memory_space<vmem>>, vector<8x128xf32>
    tpu.vector_store %arg6[%c0_13, %c0_14], %25 {strides = array<i32>} : memref<8x128xf32, #tpu.memory_space<vmem>>, vector<8x128xf32>,
    return
  }
  func.func @transform_0(%arg0: i32) -> (i32, i32) {
    %c0_i32 = arith.constant 0 : i32
    %c0_i32_0 = arith.constant 0 : i32
    return %arg0, %c0_i32 : i32, i32
  }
  func.func @transform_1(%arg0: i32) -> (i32, i32) {
    %c0_i32 = arith.constant 0 : i32
    %c0_i32_0 = arith.constant 0 : i32
    return %arg0, %c0_i32 : i32, i32
  }
  func.func @transform_2(%arg0: i32) -> (i32, i32) {
    %c0_i32 = arith.constant 0 : i32
    %c0_i32_0 = arith.constant 0 : i32
    return %arg0, %c0_i32 : i32, i32
  }
  func.func @transform_3(%arg0: i32) -> (i32, i32) {
    %c0_i32 = arith.constant 0 : i32
    %c0_i32_0 = arith.constant 0 : i32
    return %arg0, %c0_i32 : i32, i32
  }
  func.func @transform_4(%arg0: i32) -> (i32, i32) {
    %c0_i32 = arith.constant 0 : i32
    %c0_i32_0 = arith.constant 0 : i32
    return %arg0, %c0_i32 : i32, i32
  }
  func.func @transform_5(%arg0: i32) -> (i32, i32) {
    %c0_i32 = arith.constant 0 : i32
    %c0_i32_0 = arith.constant 0 : i32
    return %arg0, %c0_i32 : i32, i32
  }
}

</mosaic_0001>

<bundles_post_ra>
// kernel: tpu_custom_call.1
= control target key start
LH: loop header
LB: loop body
LE: loop exit
PB: predicated region body
PF: predicated region fallthrough
CT: control target
= control target key end

     0   :  { %10 = vsyncpa [#allocation3], 0  ;;  %s170_s0 = inlined_call_operand.hbm [shape: f32[1,128], index: 0, kind: input, shape index: {}]   ;;  %s171_s1 = inlined_call_operand.vmem [shape: f32[1,128], index: 1, kind: input, shape index: {}]   ;;  %s172_s2 = inlined_call_operand.vmem [shape: f32[1,128], index: 2, kind: input, shape index: {}]   ;;  %s173_s3 = inlined_call_operand.vmem [shape: f32[1,128], index: 3, kind: input, shape index: {}]   ;;  %s174_s4 = inlined_call_operand.vmem [shape: f32[1,128], index: 4, kind: input, shape index: {}]   ;;  %s175_s5 = inlined_call_operand.hbm [shape: f32[8,128], index: 5, kind: output, shape index: {}]  }
   0x1   :  { %11 = vsyncpa [#allocation4], 0  ;;  %s120_s18 = smov [#allocation2]  }
   0x2   :  { %s18_s19 = sshll.u32 %s120_s18, 4  ;;  %s19_s19 = int_to_ptr.vmem [resolvable:$true] %s18_s19 }
   0x3   :  { %s84_s20 = scalar_lea.vmem %s19_s19, 16  ;;  %s88_s21 = scalar_lea.vmem %s19_s19, 32 }
   0x4   :  { %p85_p0 = scmp.ne.s32.totalorder %s19_s19, %s84_s20  ;;  %p89_p1 = scmp.lt.s32.totalorder %s19_s19, %s19_s19 }
   0x5   :  { %p90_p2 = scmp.lt.s32.totalorder %s88_s21, %s84_s20 }
   0x7   :  { %p91_p3 = por %p90_p2, %p89_p1 }
   0x9   :  { %p92_p4 = pnand %p91_p3, %p85_p0 }
   0xb   :  { %95 = shalt.err (!%p92_p4)
}
   0xc   :  { %21 = dma.hbm_to_vmem [thread:$0]  %s170_s0, 16, %s19_s19, [#allocation3]  }
   0xd   :  { %116 = dma.done.wait [#allocation3], 16  }
   0xe   :  { %117 = vsyncadd [#allocation3], 4294967280  ;;  %v34_v0 = vld [vmem:[%s171_s1] sm:$0x1]  ;;  %v48_v6 = vlaneseq  ;;  %s121_s0 = smov [#allocation5]  }
   0xf   :  { %v35_v1 = vld [vmem:[%s172_s2] sm:$0x1]  ;;  %s65_s1 = sshll.u32 %s121_s0, 4  ;;  %s66_s1 = int_to_ptr.vmem [resolvable:$true] %s65_s1 }
  0x10   :  { %v36_v2 = vld [vmem:[%s173_s3] sm:$0x1]  ;;  %v49_v11 = vshrl.u32 %v48_v6, 7  ;;  %s96_s2 = scalar_lea.vmem %s66_s1, 128  ;;  %p101_p6 = scmp.lt.s32.totalorder %s66_s1, %s66_s1 }
  0x11   :  { %v37_v3 = vld [vmem:[%s174_s4] sm:$0x1]  ;;  %v41_v5 = vsub.f32 %v34_v0, %v36_v2  ;;  %p97_p5 = scmp.ne.s32.totalorder %s66_s1, %s96_s2  ;;  %p102_p7 = scmp.lt.s32.totalorder %s96_s2, %s96_s2 }
  0x12   :  { %v38_v4 = vmul.f32 0.99, %v37_v3  ;;  %v33_v7 = vld [vmem:[#allocation2] sm:$0x1]  ;;  %v54_v15 = vsub.s32 0, %v49_v11  ;;  %vm50_vm0 = vcmp.eq.s32.totalorder %v49_v11, 0 }
  0x13   :  { %v44_v9 = vmul.f32 %v41_v5, %v41_v5  ;;  %p103_p8 = por %p102_p7, %p101_p6 }
  0x14   :  { %v39_v8 = vadd.f32 %v38_v4, %v35_v1 }
  0x15   :  { %v45_v13 = vmul.f32 2.0, %v44_v9  ;;  %p104_p9 = pnand %p103_p8, %p97_p5 }
  0x16   :  { %v40_v10 = vsub.f32 %v33_v7, %v39_v8 }
  0x18   :  { %v42_v12 = vmul.f32 %v40_v10, %v40_v10 }
  0x1a   :  { %v43_v14 = vmul.f32 0.5, %v42_v12 }
  0x1c   :  { %v46_v16 = vadd.f32 %v45_v13, %v43_v14 }
  0x1e   :  { %v55_v17 = vrot.slane %v46_v16, %v54_v15 }
  0x20   :  { %v57_v18 = vsel %vm50_vm0, %v55_v17, 0.0 }
  0x21   :  { %58 = vst [vmem:[#allocation5] sm:$0xff] %v57_v18 }
  0x22   :  { %107 = shalt.err (!%p104_p9)
}
  0x23   :  { %68 = dma.vmem_to_hbm [thread:$0]  %s66_s1, 128, %s175_s5, [#allocation4]  }
  0x24   :  { %118 = dma.done.wait [#allocation4], 128  }
  0x25   :  { %119 = vsyncadd [#allocation4], 4294967168 }
  0x26   :  { %72 = vsyncpa [#allocation3], 1 }
  0x27   :  { %73 = vsyncpa [#allocation4], 1 }

</bundles_post_ra>
